<compile_context>
chip_gen: v5e
topology: v5e:2x2
jax: 0.10.0
libtpu: 0.0.40
codegen_flags: <defaults>
</compile_context>

<pallas_src>
import functools

import jax
import jax.numpy as jnp
from jax.experimental import pallas as pl
from jax.experimental.pallas import tpu as pltpu

# Deterministic "parameters" from __init__(class_num=2, alpha=0.25, gamma=2)
CLASS_NUM = 2
ALPHA = 0.25          # scalar alpha (torch.tensor(0.25))
GAMMA = 2
SIZE_AVERAGE = True


def _round_up(x, m):
    return ((x + m - 1) // m) * m


def _focal_loss_kernel(x_ref, t_ref, o_ref, acc_ref, *,
                       n_valid, tile, alpha, gamma, size_average):
    """x_ref: (C, TILE) f32 logits (classes on sublanes, samples on lanes)
       t_ref: (1, TILE) int32 class ids
       o_ref: (1, 1)    f32 scalar loss (written once, at the last step)
       acc_ref: (1, TILE) f32 lane-dense running sum of per-sample losses."""
    i = pl.program_id(0)

    @pl.when(i == 0)
    def _():
        acc_ref[...] = jnp.zeros_like(acc_ref)

    x = x_ref[...]                                     # (C, TILE) f32
    t = t_ref[...]                                     # (1, TILE) int32
    c = x.shape[0]

    # log-softmax of the target class, computed directly (no divide, no log(0)).
    m = jnp.max(x, axis=0, keepdims=True)              # (1, TILE)
    lse = jnp.log(jnp.sum(jnp.exp(x - m), axis=0, keepdims=True))
    row = jax.lax.broadcasted_iota(jnp.int32, (c, tile), 0)
    x_t = jnp.sum(jnp.where(row == t, x, 0.0), axis=0, keepdims=True)
    log_p = (x_t - m) - lse                            # (1, TILE)
    p = jnp.exp(log_p)                                 # target-class prob
    d = 1.0 - p

    # (1 - p) ** gamma for small integer gamma: explicit product (no pow).
    focal = jnp.ones_like(d)
    for _ in range(int(gamma)):
        focal = focal * d

    loss_per = (-alpha) * focal * log_p                # (1, TILE)

    # Zero out padded samples of the final partial tile.
    col = jax.lax.broadcasted_iota(jnp.int32, (1, tile), 1) + i * tile
    loss_per = jnp.where(col < n_valid, loss_per, 0.0)

    acc_ref[...] += loss_per

    @pl.when(i == pl.num_programs(0) - 1)
    def _():
        total = jnp.sum(acc_ref[...], keepdims=True)   # (1, 1)
        if size_average:
            total = total / n_valid
        o_ref[...] = total


def focal_loss(inputs, targets, *, alpha=ALPHA, gamma=GAMMA,
               size_average=SIZE_AVERAGE, tile=131072):
    """inputs: (N, C) f32 logits; targets: (N,) int class ids. Returns scalar f32."""
    n, c = inputs.shape

    # Tile over the batch; keep tiles a multiple of 128 lanes and no bigger
    # than the (padded) batch.  Default 131072 samples/step -> ~1.5 MiB/step
    # of input traffic, comfortably double-bufferable on v5e/v6e/v7x VMEM.
    tile = max(128, min(int(tile), _round_up(n, 128)))
    n_pad = _round_up(n, tile)
    num_tiles = n_pad // tile

    # Lane-dense layout: samples on lanes (last dim), classes on sublanes.
    x = inputs.astype(jnp.float32).T                   # (C, N)
    x = jnp.pad(x, ((0, 0), (0, n_pad - n)))
    t = targets.astype(jnp.int32).reshape(1, n)
    t = jnp.pad(t, ((0, 0), (0, n_pad - n)))

    kernel = functools.partial(
        _focal_loss_kernel,
        n_valid=int(n), tile=int(tile),
        alpha=float(alpha), gamma=int(gamma), size_average=bool(size_average),
    )

    out = pl.pallas_call(
        kernel,
        out_shape=jax.ShapeDtypeStruct((1, 1), jnp.float32),
        grid_spec=pltpu.PrefetchScalarGridSpec(
            num_scalar_prefetch=0,
            grid=(num_tiles,),
            in_specs=[
                pl.BlockSpec((c, tile), lambda i: (0, i)),   # logits (C, TILE)
                pl.BlockSpec((1, tile), lambda i: (0, i)),   # targets (1, TILE)
            ],
            out_specs=pl.BlockSpec((1, 1), lambda i: (0, 0)),
            scratch_shapes=[pltpu.VMEM((1, tile), jnp.float32)],
        ),
        compiler_params=pltpu.CompilerParams(
            # Accumulator carried across the batch axis -> "arbitrary".
            dimension_semantics=("arbitrary",),
            vmem_limit_bytes=32 * 1024 * 1024,
        ),
    )(x, t)
    return out[0, 0]


def focal_loss_ref(inputs, targets, *, alpha=ALPHA, gamma=GAMMA,
                   size_average=SIZE_AVERAGE):
    """Pure-JAX reference mirroring the PyTorch forward."""
    p = jax.nn.softmax(inputs.astype(jnp.float32), axis=1)
    mask = jax.nn.one_hot(targets, inputs.shape[1], dtype=jnp.float32)
    probs = jnp.sum(p * mask, axis=1, keepdims=True)
    log_p = jnp.log(probs)
    batch_loss = -alpha * jnp.power(1.0 - probs, gamma) * log_p
    return jnp.mean(batch_loss) if size_average else jnp.sum(batch_loss)


if __name__ == "__main__":
    key = jax.random.PRNGKey(0)
    k1, k2, k3, k4 = jax.random.split(key, 4)

    # Small case consistent with the module (batch=8, class_num=2).
    N, C = 8, CLASS_NUM
    inputs = jax.random.normal(k1, (N, C), dtype=jnp.float32)
    targets = jax.random.randint(k2, (N,), 0, C, dtype=jnp.int32)

    loss = focal_loss(inputs, targets)
    jax.block_until_ready(loss)
    ref = focal_loss_ref(inputs, targets)
    assert jnp.allclose(loss, ref, atol=1e-5, rtol=1e-5), (loss, ref)

    # Extra check exercising multiple grid tiles + partial-tile masking.
    N2 = 300
    inputs2 = jax.random.normal(k3, (N2, C), dtype=jnp.float32) * 3.0
    targets2 = jax.random.randint(k4, (N2,), 0, C, dtype=jnp.int32)
    loss2 = focal_loss(inputs2, targets2, tile=128)
    jax.block_until_ready(loss2)
    ref2 = focal_loss_ref(inputs2, targets2)
    assert jnp.allclose(loss2, ref2, atol=1e-5, rtol=1e-5), (loss2, ref2)

    print("KERNEL_OK")
</pallas_src>

<mosaic_0001>
module attributes {stable_mosaic.version = 11 : i64} {
  func.func @_focal_loss_kernel(%arg0: i32, %arg1: memref<2x128xf32, #tpu.memory_space<vmem>>, %arg2: memref<1x128xi32, #tpu.memory_space<vmem>>, %arg3: memref<1x1xf32, #tpu.memory_space<vmem>>, %arg4: memref<1x128xf32, #tpu.memory_space<vmem>>) attributes {dimension_semantics = [#tpu.dimension_semantics<arbitrary>], iteration_bounds = array<i64: 1>, scalar_prefetch = 0 : i64, scratch_operands = 1 : i64, tpu.core_type = #tpu.core_type<tc>, window_params = [{transform_indices = @transform_0, window_bounds = array<i64: 2, 128>}, {transform_indices = @transform_1, window_bounds = array<i64: 1, 128>}, {pipeline_mode = #tpu.pipeline_mode<synchronous>, transform_indices = @transform_2, window_bounds = array<i64: 1, 1>}]} {
    %c0_i32 = arith.constant 0 : i32
    %0 = arith.cmpi eq, %arg0, %c0_i32 : i32
    %1 = arith.extui %0 : i1 to i32
    %c0_i32_0 = arith.constant 0 : i32
    %2 = arith.cmpi ne, %1, %c0_i32_0 : i32
    scf.if %2 {
      %cst_17 = arith.constant 0.000000e+00 : f32
      %45 = vector.broadcast %cst_17 : f32 to vector<1x128xf32>
      %c0_18 = arith.constant 0 : index
      %c0_19 = arith.constant 0 : index
      %46 = vector.load %arg4[%c0_18, %c0_19] : memref<1x128xf32, #tpu.memory_space<vmem>>, vector<1x128xf32>
      tpu.vector_store %arg4[%c0_18, %c0_19], %45 {strides = array<i32>} : memref<1x128xf32, #tpu.memory_space<vmem>>, vector<1x128xf32>,
    } else {
    }
    %c0 = arith.constant 0 : index
    %c0_1 = arith.constant 0 : index
    %3 = vector.load %arg1[%c0, %c0_1] : memref<2x128xf32, #tpu.memory_space<vmem>>, vector<2x128xf32>
    %c0_2 = arith.constant 0 : index
    %c0_3 = arith.constant 0 : index
    %4 = vector.load %arg2[%c0_2, %c0_3] : memref<1x128xi32, #tpu.memory_space<vmem>>, vector<1x128xi32>
    %cst = arith.constant dense<0xFF800000> : vector<128xf32>
    %5 = vector.multi_reduction <maximumf>, %3, %cst [0] : vector<2x128xf32> to vector<128xf32>
    %6 = vector.shape_cast %5 : vector<128xf32> to vector<1x128xf32>
    %7 = vector.broadcast %6 : vector<1x128xf32> to vector<2x128xf32>
    %8 = arith.subf %3, %7 : vector<2x128xf32>
    %9 = math.exp %8 : vector<2x128xf32>
    %cst_4 = arith.constant dense<0.000000e+00> : vector<128xf32>
    %10 = vector.multi_reduction <add>, %9, %cst_4 [0] : vector<2x128xf32> to vector<128xf32>
    %11 = vector.shape_cast %10 : vector<128xf32> to vector<1x128xf32>
    %12 = math.log %11 : vector<1x128xf32>
    %13 = tpu.iota {dimensions = array<i32: 0>} : vector<2x128xi32>
    %14 = vector.broadcast %4 : vector<1x128xi32> to vector<2x128xi32>
    %15 = arith.cmpi eq, %13, %14 : vector<2x128xi32>
    %cst_5 = arith.constant 0.000000e+00 : f32
    %16 = vector.broadcast %cst_5 : f32 to vector<2x128xf32>
    %17 = arith.select %15, %3, %16 : vector<2x128xi1>, vector<2x128xf32>
    %cst_6 = arith.constant dense<0.000000e+00> : vector<128xf32>
    %18 = vector.multi_reduction <add>, %17, %cst_6 [0] : vector<2x128xf32> to vector<128xf32>
    %19 = vector.shape_cast %18 : vector<128xf32> to vector<1x128xf32>
    %20 = arith.subf %19, %6 : vector<1x128xf32>
    %21 = arith.subf %20, %12 : vector<1x128xf32>
    %22 = math.exp %21 : vector<1x128xf32>
    %cst_7 = arith.constant 1.000000e+00 : f32
    %23 = vector.broadcast %cst_7 : f32 to vector<1x128xf32>
    %24 = arith.subf %23, %22 : vector<1x128xf32>
    %cst_8 = arith.constant 1.000000e+00 : f32
    %25 = vector.broadcast %cst_8 : f32 to vector<1x128xf32>
    %26 = arith.mulf %25, %24 : vector<1x128xf32>
    %27 = arith.mulf %26, %24 : vector<1x128xf32>
    %cst_9 = arith.constant -2.500000e-01 : f32
    %28 = vector.broadcast %cst_9 : f32 to vector<1x128xf32>
    %29 = arith.mulf %28, %27 : vector<1x128xf32>
    %30 = arith.mulf %29, %21 : vector<1x128xf32>
    %31 = tpu.iota {dimensions = array<i32: 1>} : vector<1x128xi32>
    %c128_i32 = arith.constant 128 : i32
    %32 = arith.muli %arg0, %c128_i32 : i32
    %33 = vector.broadcast %32 : i32 to vector<1x128xi32>
    %34 = arith.addi %31, %33 : vector<1x128xi32>
    %c8_i32 = arith.constant 8 : i32
    %35 = vector.broadcast %c8_i32 : i32 to vector<1x128xi32>
    %36 = arith.cmpi slt, %34, %35 : vector<1x128xi32>
    %cst_10 = arith.constant 0.000000e+00 : f32
    %37 = vector.broadcast %cst_10 : f32 to vector<1x128xf32>
    %38 = arith.select %36, %30, %37 : vector<1x128xi1>, vector<1x128xf32>
    %c0_11 = arith.constant 0 : index
    %c0_12 = arith.constant 0 : index
    %39 = vector.load %arg4[%c0_11, %c0_12] : memref<1x128xf32, #tpu.memory_space<vmem>>, vector<1x128xf32>
    %40 = arith.addf %39, %38 : vector<1x128xf32>
    %c0_13 = arith.constant 0 : index
    %c0_14 = arith.constant 0 : index
    %41 = vector.load %arg4[%c0_13, %c0_14] : memref<1x128xf32, #tpu.memory_space<vmem>>, vector<1x128xf32>
    tpu.vector_store %arg4[%c0_13, %c0_14], %40 {strides = array<i32>} : memref<1x128xf32, #tpu.memory_space<vmem>>, vector<1x128xf32>,
    %c0_i32_15 = arith.constant 0 : i32
    %42 = arith.cmpi eq, %arg0, %c0_i32_15 : i32
    %43 = arith.extui %42 : i1 to i32
    %c0_i32_16 = arith.constant 0 : i32
    %44 = arith.cmpi ne, %43, %c0_i32_16 : i32
    scf.if %44 {
      %c0_17 = arith.constant 0 : index
      %c0_18 = arith.constant 0 : index
      %45 = vector.load %arg4[%c0_17, %c0_18] : memref<1x128xf32, #tpu.memory_space<vmem>>, vector<1x128xf32>
      %46 = vector.shape_cast %45 : vector<1x128xf32> to vector<1x1x128xf32>
      %cst_19 = arith.constant dense<0.000000e+00> : vector<1xf32>
      %47 = vector.multi_reduction <add>, %46, %cst_19 [1, 2] : vector<1x1x128xf32> to vector<1xf32>
      %48 = vector.shape_cast %47 : vector<1xf32> to vector<1x1x1xf32>
      %49 = vector.extract %48[0, 0, 0] : f32 from vector<1x1x1xf32>
      %50 = vector.broadcast %49 : f32 to vector<1x1xf32>
      %cst_20 = arith.constant 8.000000e+00 : f32
      %51 = vector.broadcast %cst_20 : f32 to vector<1x1xf32>
      %52 = arith.divf %50, %51 : vector<1x1xf32>
      %c0_21 = arith.constant 0 : index
      %c0_22 = arith.constant 0 : index
      %53 = vector.load %arg3[%c0_21, %c0_22] : memref<1x1xf32, #tpu.memory_space<vmem>>, vector<1x1xf32>
      tpu.vector_store %arg3[%c0_21, %c0_22], %52 {strides = array<i32>} : memref<1x1xf32, #tpu.memory_space<vmem>>, vector<1x1xf32>,
    } else {
    }
    return
  }
  func.func @transform_0(%arg0: i32) -> (i32, i32) {
    %c0_i32 = arith.constant 0 : i32
    %c0_i32_0 = arith.constant 0 : i32
    return %c0_i32, %arg0 : i32, i32
  }
  func.func @transform_1(%arg0: i32) -> (i32, i32) {
    %c0_i32 = arith.constant 0 : i32
    %c0_i32_0 = arith.constant 0 : i32
    return %c0_i32, %arg0 : i32, i32
  }
  func.func @transform_2(%arg0: i32) -> (i32, i32) {
    %c0_i32 = arith.constant 0 : i32
    %c0_i32_0 = arith.constant 0 : i32
    %c0_i32_1 = arith.constant 0 : i32
    return %c0_i32, %c0_i32_0 : i32, i32
  }
}

</mosaic_0001>

<bundles_post_ra>
// kernel: tpu_custom_call.1
= control target key start
LH: loop header
LB: loop body
LE: loop exit
PB: predicated region body
PF: predicated region fallthrough
CT: control target
= control target key end

     0   :  { %7 = vsyncpa [#allocation4], 0  ;;  %s267_s0 = inlined_call_operand.hbm [shape: f32[2,128], index: 0, kind: input, shape index: {}]   ;;  %s268_s1 = inlined_call_operand.hbm [shape: s32[1,128], index: 1, kind: input, shape index: {}]   ;;  %s269_s2 = inlined_call_operand.hbm [shape: f32[1,1], index: 2, kind: output, shape index: {}]  }
   0x1   :  { %8 = vsyncpa [#allocation7], 0 }
   0x2   :  { %9 = vsyncpa [#allocation5], 0  ;;  %s15_s11 = sshll.u32 %s267_s0, 4  ;;  %s235_s12 = smov [#allocation3]   ;;  %s16_s11 = int_to_ptr.hbm [resolvable:$true] %s15_s11 }
   0x3   :  { %s17_s13 = sshll.u32 %s235_s12, 4  ;;  %s26_s16 = sshll.u32 %s268_s1, 4  ;;  %s18_s13 = int_to_ptr.vmem [resolvable:$true] %s17_s13  ;;  %s27_s16 = int_to_ptr.hbm [resolvable:$true] %s26_s16 }
   0x4   :  { %20 = dma.hbm_to_vmem [thread:$0]  %s16_s11, 32, %s18_s13, [#allocation4]  }
   0x5   :  { %s236_s17 = smov [#allocation6]  }
   0x6   :  { %s28_s18 = sshll.u32 %s236_s17, 4  ;;  %s29_s18 = int_to_ptr.vmem [resolvable:$true] %s28_s18 }
   0x7   :  { %31 = dma.hbm_to_vmem [thread:$0]  %s27_s16, 16, %s29_s18, [#allocation7]  }
   0x8   :  { %229 = dma.done.wait [#allocation4], 32  }
   0x9   :  { %230 = vsyncadd [#allocation4], 4294967264 }
   0xa   :  { %231 = dma.done.wait [#allocation7], 16  }
   0xb   :  { %232 = vsyncadd [#allocation7], 4294967280  ;;  %v237_v0 = vmov 0.0   ;;  %vm47_vm0 = vcmask 1041408   ;;  %v45_v1 = vld [vmem:[#allocation3] sm:$0x3]  ;;  %v67_v4 = vlaneseq }
   0xc   :  { %44 = vst [vmem:[#allocation2] sm:$0x1] %v237_v0  ;;  %v48_v2 = vsel %vm47_vm0, %v45_v1, -inf  ;;  %v148_v8 = vld [vmem:[#allocation6] ss:$0 sm:$0xff]  ;;  %vm101_vm3 = vcmask 1040384  }
   0xd   :  { %v49_v3 = vrot.slane %v48_v2, 4  ;;  %v68_v7 = vshrl.u32 %v67_v4, 7  ;;  %v88_v37 = vand.u32 127, %v67_v4  ;;  %v238_v53 = vmov 8.0   ;;  %s239_s0 = smov [#allocation8]   ;;  %s130_s21 = sshll.u32 %s269_s2, 4  ;;  %s131_s21 = int_to_ptr.hbm [resolvable:$true] %s130_s21 }
   0xe   :  { %s128_s1 = sshll.u32 %s239_s0, 4  ;;  %vm121_vm5 = vcmask 0   ;;  %s129_s1 = int_to_ptr.vmem [resolvable:$true] %s128_s1 }
   0xf   :  { %v50_v5 = vmax.f32 %v48_v2, %v49_v3  ;;  %vm70_vm1 = vcmp.eq.s32.totalorder %v68_v7, %v148_v8  ;;  %vm92_vm2 = vcmp.lt.s32.totalorder %v88_v37, 8 }
  0x10   :  { %v71_v12 = vsel %vm70_vm1, %v45_v1, 0.0 }
  0x11   :  { %v51_v6 = vrot.slane %v50_v5, 2  ;;  %v72_v15 = vsel %vm47_vm0, %v71_v12, 0.0 }
  0x12   :  { %v73_v16 = vrot.slane %v72_v15, 4 }
  0x13   :  { %v52_v9 = vmax.f32 %v50_v5, %v51_v6  ;;  %v94_v41 = vld [vmem:[#allocation2] sm:$0x1] }
  0x14   :  { %v74_v17 = vadd.f32 %v73_v16, %v72_v15 }
  0x15   :  { %v53_v10 = vrot.slane %v52_v9, 1 }
  0x16   :  { %v75_v21 = vrot.slane %v74_v17, 2 }
  0x17   :  { %v54_v11 = vmax.f32 %v52_v9, %v53_v10 }
  0x18   :  { %v76_v24 = vadd.f32 %v75_v21, %v74_v17 }
  0x19   :  { %v55_v13 = vsub.f32 %v45_v1, %v54_v11 }
  0x1a   :  { %v77_v27 = vrot.slane %v76_v24, 1 }
  0x1b   :  { %v56_v14 = vmul.f32 1.442695, %v55_v13 }
  0x1c   :  { %v78_v29 = vadd.f32 %v77_v27, %v76_v24 }
  0x1d   :  { %149 = vpow2.f32 %v56_v14 }
  0x1e   :  { %v79_v30 = vsub.f32 %v78_v29, %v54_v11 }
  0x23   :  { %v150_v18 = vpop.eup %149 }
  0x24   :  { %v58_v19 = vsel %vm47_vm0, %v150_v18, 0.0 }
  0x25   :  { %v59_v20 = vrot.slane %v58_v19, 4 }
  0x27   :  { %v60_v22 = vadd.f32 %v59_v20, %v58_v19 }
  0x29   :  { %v61_v23 = vrot.slane %v60_v22, 2 }
  0x2b   :  { %v62_v25 = vadd.f32 %v61_v23, %v60_v22 }
  0x2d   :  { %v63_v26 = vrot.slane %v62_v25, 1 }
  0x2f   :  { %v64_v28 = vadd.f32 %v63_v26, %v62_v25 }
  0x31   :  { %151 = vlog2.f32 %v64_v28 }
  0x37   :  { %v152_v31 = vpop.eup %151 }
  0x38   :  { %v66_v32 = vmul.f32 0.6931472, %v152_v31 }
  0x3a   :  { %v80_v33 = vsub.f32 %v79_v30, %v66_v32 }
  0x3c   :  { %v81_v34 = vmul.f32 1.442695, %v80_v33 }
  0x3e   :  { %153 = vpow2.f32 %v81_v34 }
  0x3f   :  { %155 = vrcp.f32 %v238_v53 }
  0x44   :  { %v154_v35 = vpop.eup %153 }
  0x45   :  { %v83_v36 = vsub.f32 1.0, %v154_v35  ;;  %v156_v54 = vpop.eup %155 }
  0x46   :  { %v114_v55 = vmul.f32 8.0, %v156_v54  ;;  %vm118_vm4 = vweird.f32 %v156_v54 }
  0x47   :  { %v84_v38 = vmul.f32 %v83_v36, %v83_v36 }
  0x48   :  { %v115_v56 = vsub.f32 1.0, %v114_v55 }
  0x49   :  { %v85_v39 = vmul.f32 -0.25, %v84_v38 }
  0x4a   :  { %v116_v57 = vmul.f32 %v156_v54, %v115_v56 }
  0x4b   :  { %v86_v40 = vmul.f32 %v85_v39, %v80_v33 }
  0x4c   :  { %v117_v58 = vadd.f32 %v156_v54, %v116_v57 }
  0x4d   :  { %v93_v42 = vsel %vm92_vm2, %v86_v40, 0.0 }
  0x4e   :  { %v95_v43 = vadd.f32 %v94_v41, %v93_v42  ;;  %v119_v59 = vsel %vm118_vm4, %v156_v54, %v117_v58 }
  0x50   :  { %96 = vst [vmem:[#allocation2] sm:$0x1] %v95_v43 }
  0x57   :  { %v100_v44 = vld [vmem:[#allocation2] sm:$0x1] }
  0x58   :  { %v102_v45 = vsel %vm101_vm3, %v100_v44, 0.0 }
  0x59   :  { %103 = vadd.xlane.f32.xlu0 %v102_v45 }
  0xcc   :  { %v104_v46 = vpop.xlane.xlu0 %103 }
  0xcd   :  { %v105_v47 = vrot.slane %v104_v46, 4 }
  0xcf   :  { %v106_v48 = vadd.f32 %v105_v47, %v104_v46 }
  0xd1   :  { %v107_v49 = vrot.slane %v106_v48, 2 }
  0xd3   :  { %v108_v50 = vadd.f32 %v107_v49, %v106_v48 }
  0xd5   :  { %v109_v51 = vrot.slane %v108_v50, 1 }
  0xd7   :  { %v110_v52 = vadd.f32 %v109_v51, %v108_v50 }
  0xd9   :  { %141 = vpush %v110_v52 }
 0x10a   :  { %s142_s22 = spop %141 }
 0x10b   :  { %v112_v60 = vstv %s142_s22 }
 0x10c   :  { %v120_v61 = vmul.f32 %v119_v59, %v112_v60 }
 0x10e   :  { %122 = vst.msk [vmem:[#allocation8] sm:$0x1] %vm121_vm5, %v120_v61 }
 0x10f   :  { %133 = dma.vmem_to_hbm [thread:$0]  %s129_s1, 16, %s131_s21, [#allocation5]  }
 0x110   :  { %233 = dma.done.wait [#allocation5], 16  }
 0x111   :  { %234 = vsyncadd [#allocation5], 4294967280 }
 0x112   :  { %138 = vsyncpa [#allocation4], 1 }
 0x113   :  { %139 = vsyncpa [#allocation7], 1 }
 0x114   :  { %140 = vsyncpa [#allocation5], 1 }

</bundles_post_ra>
